<compile_context>
chip_gen: v7x
topology: tpu7x:2x2x1
jax: 0.10.0
libtpu: 0.0.40
codegen_flags: <defaults>
</compile_context>

<pallas_src>
import functools

import jax
import jax.numpy as jnp
from jax.experimental import pallas as pl
from jax.experimental.pallas import tpu as pltpu


def _round_up(x, m):
    return ((x + m - 1) // m) * m


def _mlp_softmax_kernel(n_layers, d_out, x_ref, *refs):
    """Fused MLP forward + masked softmax for one batch tile.

    refs = (w_0, ..., w_{n_layers-1}, out).  All feature dims are padded to a
    multiple of 128; `d_out` is the true (unpadded) output width.
    """
    w_refs = refs[:n_layers]
    o_ref = refs[n_layers]

    h = x_ref[...]                                   # bf16 (tb, d_in_p)
    for i in range(n_layers):
        # Bias-free Linear: bf16 operands, f32 accumulation on the MXU.
        acc = jnp.dot(h, w_refs[i][...], preferred_element_type=jnp.float32)
        if i < n_layers - 1:
            # LeakyReLU (PyTorch default negative_slope=0.01) in f32, then
            # cast back to bf16 for the next matmul operand.
            acc = jnp.where(acc > 0, acc, 0.01 * acc)
            h = acc.astype(jnp.bfloat16)
        else:
            h = acc                                  # f32 logits (tb, d_out_p)

    # Mask the padded logit columns so they don't contribute to the softmax.
    cols = jax.lax.broadcasted_iota(jnp.int32, h.shape, dimension=1)
    h = jnp.where(cols < d_out, h, -jnp.inf)

    # Numerically-stable softmax over the last dim (== F.softmax(..., dim=-1)).
    m = jnp.max(h, axis=-1, keepdims=True)
    e = jnp.exp(h - m)                               # padded cols -> exp(-inf) = 0
    denom = jnp.sum(e, axis=-1, keepdims=True)
    o_ref[...] = (e * pl.reciprocal(denom, approx=True)).astype(o_ref.dtype)


def classical_nn_forward(x, weights, *, batch_tile=None):
    """softmax(MLP(x), dim=-1) via a single fused Pallas kernel.

    x:        (B, size[0]) float32
    weights:  list of (size[i], size[i+1]) float32 arrays (bias-free Linears)
    """
    B, d_in = x.shape
    sizes = [d_in] + [w.shape[1] for w in weights]
    d_out = sizes[-1]
    n_layers = len(weights)

    # --- Lane-dense padding of every feature dim --------------------------
    p = [_round_up(s, 128) for s in sizes]

    # --- Batch tile selection (multiple of 16, VMEM-budget aware) ---------
    if batch_tile is None:
        batch_tile = min(_round_up(B, 16), 512)
    tb = max(16, _round_up(batch_tile, 16))

    # Conservative VMEM budget (fits v7x 64 MiB / 32 MiB scoped default):
    # 2x double-buffered x tile (bf16) + 2x out tile (f32) + 2x each weight (bf16).
    weight_bytes = 2 * sum(2 * p[i] * p[i + 1] for i in range(n_layers))
    budget = 16 * 1024 * 1024
    while tb > 16 and (2 * tb * p[0] * 2 + 2 * tb * p[-1] * 4 + weight_bytes) > budget:
        tb //= 2
        tb = max(16, _round_up(tb, 16))

    Bp = _round_up(B, tb)

    # --- Pad + cast inputs/weights once in the wrapper --------------------
    x_p = jnp.zeros((Bp, p[0]), jnp.bfloat16).at[:B, :d_in].set(
        x.astype(jnp.bfloat16))
    w_p = []
    for i, w in enumerate(weights):
        wp = jnp.zeros((p[i], p[i + 1]), jnp.bfloat16).at[
            : w.shape[0], : w.shape[1]].set(w.astype(jnp.bfloat16))
        w_p.append(wp)

    kernel = functools.partial(_mlp_softmax_kernel, n_layers, d_out)

    in_specs = [pl.BlockSpec((tb, p[0]), lambda b: (b, 0))]
    for i in range(n_layers):
        # Constant index_map -> block index never changes across grid steps, so
        # the pipeline keeps each weight resident in VMEM (no re-DMA per tile).
        in_specs.append(pl.BlockSpec((p[i], p[i + 1]), lambda b: (0, 0)))

    out_spec = pl.BlockSpec((tb, p[-1]), lambda b: (b, 0))

    flops = 2 * Bp * sum(p[i] * p[i + 1] for i in range(n_layers))
    bytes_accessed = (x_p.size * 2
                      + sum(w.size * 2 for w in w_p)
                      + Bp * p[-1] * 4)
    cost = pl.CostEstimate(flops=flops,
                           transcendentals=Bp * p[-1],
                           bytes_accessed=bytes_accessed)

    out_p = pl.pallas_call(
        kernel,
        out_shape=jax.ShapeDtypeStruct((Bp, p[-1]), jnp.float32),
        grid_spec=pltpu.PrefetchScalarGridSpec(
            num_scalar_prefetch=0,
            grid=(Bp // tb,),
            in_specs=in_specs,
            out_specs=out_spec,
        ),
        compiler_params=pltpu.CompilerParams(
            dimension_semantics=("parallel",)),
        cost_estimate=cost,
    )(x_p, *w_p)

    return out_p[:B, :d_out]


def _reference_forward(x, weights):
    h = x
    for i, w in enumerate(weights):
        h = h @ w
        if i < len(weights) - 1:
            h = jnp.where(h > 0, h, 0.01 * h)
    return jax.nn.softmax(h, axis=-1)


if __name__ == "__main__":
    # size = [inputsize, hidden, outputsize]  (as in ClassicalNeuralNetwork.__init__)
    size = [4, 32, 4]
    batch = 8

    key = jax.random.PRNGKey(0)
    kx, *kws = jax.random.split(key, 1 + len(size) - 1)

    x = jax.random.normal(kx, (batch, size[0]), dtype=jnp.float32)
    weights = []
    for i, kw in enumerate(kws):
        fan_in = size[i]
        bound = 1.0 / (fan_in ** 0.5)  # PyTorch Linear default init range
        w = jax.random.uniform(kw, (size[i], size[i + 1]),
                               minval=-bound, maxval=bound, dtype=jnp.float32)
        weights.append(w)

    out = classical_nn_forward(x, weights)
    out = jax.block_until_ready(out)

    ref = _reference_forward(x, weights)
    assert out.shape == (batch, size[-1])
    # bf16 MXU operands (f32 accumulation) -> loosened tolerance vs f32 reference.
    assert jnp.allclose(out, ref, atol=2e-2, rtol=2e-2), (
        f"max abs err {jnp.max(jnp.abs(out - ref))}")
    # rows sum to 1 (softmax; approx reciprocal -> ~1e-3 tolerance)
    assert jnp.allclose(jnp.sum(out, axis=-1), jnp.ones((batch,)), atol=3e-3)

    print("KERNEL_OK")
</pallas_src>

<mosaic_0001>
module attributes {stable_mosaic.version = 11 : i64} {
  func.func @_mlp_softmax_kernel(%arg0: i32, %arg1: memref<16x128xbf16, #tpu.memory_space<vmem>>, %arg2: memref<128x128xbf16, #tpu.memory_space<vmem>>, %arg3: memref<128x128xbf16, #tpu.memory_space<vmem>>, %arg4: memref<16x128xf32, #tpu.memory_space<vmem>>) attributes {dimension_semantics = [#tpu.dimension_semantics<parallel>], iteration_bounds = array<i64: 1>, scalar_prefetch = 0 : i64, scratch_operands = 0 : i64, tpu.core_type = #tpu.core_type<tc>, window_params = [{transform_indices = @transform_0, window_bounds = array<i64: 16, 128>}, {pipeline_mode = #tpu.pipeline_mode<synchronous>, transform_indices = @transform_1, window_bounds = array<i64: 128, 128>}, {pipeline_mode = #tpu.pipeline_mode<synchronous>, transform_indices = @transform_2, window_bounds = array<i64: 128, 128>}, {transform_indices = @transform_3, window_bounds = array<i64: 16, 128>}]} {
    %c0 = arith.constant 0 : index
    %c0_0 = arith.constant 0 : index
    %0 = vector.load %arg1[%c0, %c0_0] : memref<16x128xbf16, #tpu.memory_space<vmem>>, vector<16x128xbf16>
    %c0_1 = arith.constant 0 : index
    %c0_2 = arith.constant 0 : index
    %1 = vector.load %arg2[%c0_1, %c0_2] : memref<128x128xbf16, #tpu.memory_space<vmem>>, vector<128x128xbf16>
    %cst = arith.constant dense<0.000000e+00> : vector<16x128xf32>
    %2 = tpu.matmul %0, %1, %cst {dimension_numbers = #tpu.dot_dimension_numbers<[1], [0], [0], [1], [0, 0, 1, 1], [], []>} : vector<16x128xbf16>, vector<128x128xbf16>, vector<16x128xf32> -> vector<16x128xf32>
    %cst_3 = arith.constant 0.000000e+00 : f32
    %3 = vector.broadcast %cst_3 : f32 to vector<16x128xf32>
    %4 = arith.cmpf ogt, %2, %3 : vector<16x128xf32>
    %cst_4 = arith.constant 0.00999999977 : f32
    %5 = vector.broadcast %cst_4 : f32 to vector<16x128xf32>
    %6 = arith.mulf %5, %2 : vector<16x128xf32>
    %7 = arith.select %4, %2, %6 : vector<16x128xi1>, vector<16x128xf32>
    %8 = arith.truncf %7 : vector<16x128xf32> to vector<16x128xbf16>
    %c0_5 = arith.constant 0 : index
    %c0_6 = arith.constant 0 : index
    %9 = vector.load %arg3[%c0_5, %c0_6] : memref<128x128xbf16, #tpu.memory_space<vmem>>, vector<128x128xbf16>
    %cst_7 = arith.constant dense<0.000000e+00> : vector<16x128xf32>
    %10 = tpu.matmul %8, %9, %cst_7 {dimension_numbers = #tpu.dot_dimension_numbers<[1], [0], [0], [1], [0, 0, 1, 1], [], []>} : vector<16x128xbf16>, vector<128x128xbf16>, vector<16x128xf32> -> vector<16x128xf32>
    %11 = tpu.iota {dimensions = array<i32: 1>} : vector<16x128xi32>
    %c4_i32 = arith.constant 4 : i32
    %12 = vector.broadcast %c4_i32 : i32 to vector<16x128xi32>
    %13 = arith.cmpi slt, %11, %12 : vector<16x128xi32>
    %cst_8 = arith.constant 0xFF800000 : f32
    %14 = vector.broadcast %cst_8 : f32 to vector<16x128xf32>
    %15 = arith.select %13, %10, %14 : vector<16x128xi1>, vector<16x128xf32>
    %cst_9 = arith.constant dense<0xFF800000> : vector<16xf32>
    %16 = vector.multi_reduction <maximumf>, %15, %cst_9 [1] : vector<16x128xf32> to vector<16xf32>
    %17 = vector.shape_cast %16 : vector<16xf32> to vector<16x1xf32>
    %18 = vector.broadcast %17 : vector<16x1xf32> to vector<16x128xf32>
    %19 = arith.subf %15, %18 : vector<16x128xf32>
    %20 = math.exp %19 : vector<16x128xf32>
    %cst_10 = arith.constant dense<0.000000e+00> : vector<16xf32>
    %21 = vector.multi_reduction <add>, %20, %cst_10 [1] : vector<16x128xf32> to vector<16xf32>
    %22 = vector.shape_cast %21 : vector<16xf32> to vector<16x1xf32>
    %23 = tpu.reciprocal %22 {approx = true} : vector<16x1xf32> -> vector<16x1xf32>
    %24 = vector.broadcast %23 : vector<16x1xf32> to vector<16x128xf32>
    %25 = arith.mulf %20, %24 : vector<16x128xf32>
    %c0_11 = arith.constant 0 : index
    %c0_12 = arith.constant 0 : index
    %26 = vector.load %arg4[%c0_11, %c0_12] : memref<16x128xf32, #tpu.memory_space<vmem>>, vector<16x128xf32>
    tpu.vector_store %arg4[%c0_11, %c0_12], %25 {strides = array<i32>} : memref<16x128xf32, #tpu.memory_space<vmem>>, vector<16x128xf32>,
    return
  }
  func.func @transform_0(%arg0: i32) -> (i32, i32) {
    %c0_i32 = arith.constant 0 : i32
    %c0_i32_0 = arith.constant 0 : i32
    return %arg0, %c0_i32 : i32, i32
  }
  func.func @transform_1(%arg0: i32) -> (i32, i32) {
    %c0_i32 = arith.constant 0 : i32
    %c0_i32_0 = arith.constant 0 : i32
    %c0_i32_1 = arith.constant 0 : i32
    return %c0_i32, %c0_i32_0 : i32, i32
  }
  func.func @transform_2(%arg0: i32) -> (i32, i32) {
    %c0_i32 = arith.constant 0 : i32
    %c0_i32_0 = arith.constant 0 : i32
    %c0_i32_1 = arith.constant 0 : i32
    return %c0_i32, %c0_i32_0 : i32, i32
  }
  func.func @transform_3(%arg0: i32) -> (i32, i32) {
    %c0_i32 = arith.constant 0 : i32
    %c0_i32_0 = arith.constant 0 : i32
    return %arg0, %c0_i32 : i32, i32
  }
}

</mosaic_0001>

<bundles_post_ra>
// kernel: tpu_custom_call.1
= control target key start
LH: loop header
LB: loop body
LE: loop exit
PB: predicated region body
PF: predicated region fallthrough
CT: control target
= control target key end

     0   :  { %8 = vsyncpa [#allocation3], 0  ;;  %s623_s0 = inlined_call_operand.hbm [shape: bf16[16,128], index: 0, kind: input, shape index: {}]   ;;  %s624_s1 = inlined_call_operand.hbm [shape: bf16[128,128], index: 1, kind: input, shape index: {}]   ;;  %s625_s2 = inlined_call_operand.hbm [shape: bf16[128,128], index: 2, kind: input, shape index: {}]   ;;  %s626_s3 = inlined_call_operand.hbm [shape: f32[16,128], index: 3, kind: output, shape index: {}]  }
   0x1   :  { %9 = vsyncpa [#allocation6], 0 }
   0x2   :  { %10 = vsyncpa [#allocation4], 0  ;;  %s529_s12 = smov [#allocation5]   ;;  %s530_s14 = smov [#allocation2]  }
   0x3   :  { %s28_s13 = sshll.u32 %s529_s12, 4  ;;  %s16_s15 = sshll.u32 %s530_s14, 4  ;;  %s29_s13 = int_to_ptr.vmem [resolvable:$true] %s28_s13  ;;  %s559_s15 = int_to_ptr.vmem [resolvable:$true] %s16_s15 }
   0x4   :  { %s435_s18 = scalar_lea.hbm %s624_s1, 1024 }
   0x5   :  { %p436_p0 = scmp.ne.s32.totalorder %s624_s1, %s435_s18  ;;  %p439_p1 = scmp.lt.u32.totalorder %s435_s18, %s624_s1 }
   0x7   :  { %p441_p2 = pnand %p439_p1, %p436_p0 }
   0x9   :  { %444 = shalt.err (!%p441_p2)
}
   0xa   :  { %s445_s23 = scalar_lea.vmem %s29_s13, 1024  ;;  %p450_p4 = scmp.lt.s32.totalorder %s29_s13, %s29_s13 }
   0xb   :  { %p446_p3 = scmp.ne.s32.totalorder %s29_s13, %s445_s23  ;;  %p451_p5 = scmp.lt.s32.totalorder %s445_s23, %s445_s23 }
   0xd   :  { %p452_p6 = por %p451_p5, %p450_p4 }
   0xf   :  { %p453_p7 = pnand %p452_p6, %p446_p3 }
  0x11   :  { %456 = shalt.err (!%p453_p7)
}
  0x12   :  { %s531_s24 = smov 64   ;;  %s532_s25 = smov 4  }
  0x13   :  { %34 = dma.hbm_to_vmem [thread:$0]  %s624_s1, 1024, %s29_s13, [#allocation6], %s531_s24, %s531_s24, %s532_s25  }
  0x14   :  { %s457_s30 = scalar_lea.hbm %s623_s0, 128 }
  0x15   :  { %p458_p8 = scmp.ne.s32.totalorder %s623_s0, %s457_s30  ;;  %p461_p9 = scmp.lt.u32.totalorder %s457_s30, %s623_s0 }
  0x17   :  { %p463_p10 = pnand %p461_p9, %p458_p8 }
  0x19   :  { %466 = shalt.err (!%p463_p10)
}
  0x1a   :  { %s467_s8 = scalar_lea.vmem %s559_s15, 128  ;;  %p472_p12 = scmp.lt.s32.totalorder %s559_s15, %s559_s15 }
  0x1b   :  { %p468_p11 = scmp.ne.s32.totalorder %s559_s15, %s467_s8  ;;  %p473_p13 = scmp.lt.s32.totalorder %s467_s8, %s467_s8 }
  0x1d   :  { %p474_p0 = por %p473_p13, %p472_p12 }
  0x1f   :  { %p475_p1 = pnand %p474_p0, %p468_p11 }
  0x21   :  { %478 = shalt.err (!%p475_p1)
}
  0x22   :  { %22 = dma.hbm_to_vmem [thread:$0]  %s623_s0, 128, %s559_s15, [#allocation3], %s531_s24, %s531_s24, %s532_s25  }
  0x23   :  { %s533_s10 = smov [#allocation7]   ;;  %s479_s14 = scalar_lea.hbm %s625_s2, 1024 }
  0x24   :  { %s40_s11 = sshll.u32 %s533_s10, 4  ;;  %p480_p2 = scmp.ne.s32.totalorder %s625_s2, %s479_s14  ;;  %s41_s11 = int_to_ptr.vmem [resolvable:$true] %s40_s11 }
  0x25   :  { %p483_p3 = scmp.lt.u32.totalorder %s479_s14, %s625_s2 }
  0x27   :  { %p485_p4 = pnand %p483_p3, %p480_p2 }
  0x29   :  { %488 = shalt.err (!%p485_p4)
}
  0x2a   :  { %s489_s20 = scalar_lea.vmem %s41_s11, 1024  ;;  %p494_p6 = scmp.lt.s32.totalorder %s41_s11, %s41_s11 }
  0x2b   :  { %p490_p5 = scmp.ne.s32.totalorder %s41_s11, %s489_s20  ;;  %p495_p7 = scmp.lt.s32.totalorder %s489_s20, %s489_s20 }
  0x2d   :  { %p496_p8 = por %p495_p7, %p494_p6 }
  0x2f   :  { %p497_p9 = pnand %p496_p8, %p490_p5 }
  0x31   :  { %500 = shalt.err (!%p497_p9)
}
  0x32   :  { %46 = dma.hbm_to_vmem [thread:$0]  %s625_s2, 1024, %s41_s11, [#allocation6], %s531_s24, %s531_s24, %s532_s25  }
  0x33   :  { %523 = dma.done.wait [#allocation3], 128  }
  0x34   :  { %524 = vsyncadd [#allocation3], 4294967168 }
  0x35   :  { %525 = dma.done.wait [#allocation6], 2048  }
  0x36   :  { %526 = vsyncadd [#allocation6], 4294965248  ;;  %v534_v0 = vmov 0.0   ;;  %vm535_vm0 = vmmov 0   ;;  %v410_v1 = vld [vmem:[#allocation5] sm:$0xff]   ;;  %v411_v2 = vld [vmem:[#allocation5 + $0x8] sm:$0xff]   ;;  %v282_v27 = vlaneseq }
  0x37   :  { %360 = vmatprep.subr.bf16.mxu0 %v534_v0  ;;  %376 = vmatprep.mubr.msk.bf16.mxu0 %vm535_vm0, %v534_v0  ;;  %v412_v3 = vld [vmem:[#allocation5 + $0x10] sm:$0xff]   ;;  %v419_v4 = vld [vmem:[#allocation7] sm:$0xff]   ;;  %v413_v5 = vld [vmem:[#allocation5 + $0x18] sm:$0xff]   ;;  %s536_s2 = smov [#allocation8]  }
  0x38   :  { %380 = vmatprep.subr.bf16.mxu1 %v534_v0  ;;  %396 = vmatprep.mubr.msk.bf16.mxu1 %vm535_vm0, %v534_v0  ;;  %v420_v6 = vld [vmem:[#allocation7 + $0x8] sm:$0xff]   ;;  %v414_v7 = vld [vmem:[#allocation5 + $0x20] sm:$0xff]   ;;  %v421_v8 = vld [vmem:[#allocation7 + $0x10] sm:$0xff]   ;;  %v283_v28 = vand.u32 127, %v282_v27  ;;  %s312_s21 = sshll.u32 %s536_s2, 4  ;;  %s313_s21 = int_to_ptr.vmem [resolvable:$true] %s312_s21 }
  0x39   :  { %361 = vmatpush3.bf16.msra.mxu0 %v410_v1  ;;  %381 = vmatpush3.bf16.msra.mxu1 %v419_v4  ;;  %v415_v9 = vld [vmem:[#allocation5 + $0x28] sm:$0xff]   ;;  %v422_v10 = vld [vmem:[#allocation7 + $0x18] sm:$0xff]   ;;  %v416_v11 = vld [vmem:[#allocation5 + $0x30] sm:$0xff]   ;;  %s501_s22 = scalar_lea.vmem %s313_s21, 256  ;;  %p506_p11 = scmp.lt.s32.totalorder %s313_s21, %s313_s21 }
  0x3a   :  { %362 = vmatprep.subr.bf16.mxu0 %v534_v0  ;;  %382 = vmatprep.subr.bf16.mxu1 %v534_v0  ;;  %v423_v12 = vld [vmem:[#allocation7 + $0x20] sm:$0xff]   ;;  %v417_v13 = vld [vmem:[#allocation5 + $0x38] sm:$0xff]   ;;  %v424_v14 = vld [vmem:[#allocation7 + $0x28] sm:$0xff]   ;;  %vm284_vm3 = vcmp.lt.s32.totalorder %v283_v28, 4  ;;  %p502_p10 = scmp.ne.s32.totalorder %s313_s21, %s501_s22  ;;  %p507_p12 = scmp.lt.s32.totalorder %s501_s22, %s501_s22 }
  0x3b   :  { %v418_v15 = vld [vmem:[#allocation2] sm:$0xff]   ;;  %v425_v16 = vld [vmem:[#allocation7 + $0x30] sm:$0xff]  }
  0x3c   :  { %v426_v17 = vld [vmem:[#allocation7 + $0x38] sm:$0xff]   ;;  %p508_p13 = por %p507_p12, %p506_p11 }
  0x3d   :  { %363 = vmatpush3.bf16.msra.mxu0 %v411_v2  ;;  %383 = vmatpush3.bf16.msra.mxu1 %v420_v6 }
  0x3e   :  { %364 = vmatprep.subr.bf16.mxu0 %v534_v0  ;;  %384 = vmatprep.subr.bf16.mxu1 %v534_v0  ;;  %p509_p0 = pnand %p508_p13, %p502_p10 }
  0x41   :  { %365 = vmatpush3.bf16.msra.mxu0 %v412_v3  ;;  %385 = vmatpush3.bf16.msra.mxu1 %v421_v8 }
  0x42   :  { %366 = vmatprep.subr.bf16.mxu0 %v534_v0  ;;  %386 = vmatprep.subr.bf16.mxu1 %v534_v0 }
  0x45   :  { %367 = vmatpush3.bf16.msra.mxu0 %v413_v5  ;;  %387 = vmatpush3.bf16.msra.mxu1 %v422_v10 }
  0x46   :  { %368 = vmatprep.subr.bf16.mxu0 %v534_v0  ;;  %388 = vmatprep.subr.bf16.mxu1 %v534_v0 }
  0x49   :  { %369 = vmatpush3.bf16.msra.mxu0 %v414_v7  ;;  %389 = vmatpush3.bf16.msra.mxu1 %v423_v12 }
  0x4a   :  { %370 = vmatprep.subr.bf16.mxu0 %v534_v0  ;;  %390 = vmatprep.subr.bf16.mxu1 %v534_v0 }
  0x4d   :  { %371 = vmatpush3.bf16.msra.mxu0 %v415_v9  ;;  %391 = vmatpush3.bf16.msra.mxu1 %v424_v14 }
  0x4e   :  { %372 = vmatprep.subr.bf16.mxu0 %v534_v0  ;;  %392 = vmatprep.subr.bf16.mxu1 %v534_v0 }
  0x51   :  { %373 = vmatpush3.bf16.msra.mxu0 %v416_v11  ;;  %393 = vmatpush3.bf16.msra.mxu1 %v425_v16 }
  0x52   :  { %374 = vmatprep.subr.bf16.mxu0 %v534_v0  ;;  %394 = vmatprep.subr.bf16.mxu1 %v534_v0 }
  0x55   :  { %375 = vmatpush3.bf16.msra.mxu0 %v417_v13  ;;  %395 = vmatpush3.bf16.msra.mxu1 %v426_v17 }
  0x58   :  { %377 = vmatmul.mubr.bf16.vlgmr.msra.gmra.mrb[0].mxu0 %v418_v15 }
 0x12b   :  { %v163_v18 = vpop.f32.mrb[0].mxu0 }
 0x12c   :  { %v172_v19 = vmul.f32 0.01, %v163_v18  ;;  %v378_v20 = vpop.f32.mrb[1].mxu0  ;;  %vm170_vm1 = vcmp.gt.f32.partialorder %v163_v18, 0.0 }
 0x12d   :  { %v166_v21 = vpop.f32.mrb[2].mxu0 }
 0x12e   :  { %vm171_vm2 = vcmp.gt.f32.partialorder %v166_v21, 0.0  ;;  %v173_v22 = vmul.f32 0.01, %v166_v21  ;;  %v379_v23 = vpop.f32.mrb[3].mxu0  ;;  %v174_v24 = vsel %vm170_vm1, %v163_v18, %v172_v19 }
 0x130   :  { %v175_v25 = vsel %vm171_vm2, %v166_v21, %v173_v22 }
 0x131   :  { %v176_v26 = vpack.c.bf16 %v175_v25, %v174_v24 }
 0x133   :  { %397 = vmatmul.mubr.bf16.vlgmr.msra.gmra.mrb[0].mxu1 %v176_v26 }
 0x206   :  { %v275_v29 = vpop.f32.mrb[0].mxu1 }
 0x207   :  { %v398_v30 = vpop.f32.mrb[1].mxu1  ;;  %v285_v31 = vsel %vm284_vm3, %v275_v29, -inf }
 0x208   :  { %287 = vmax.xlane.f32.xlu0 %v285_v31  ;;  %v278_v32 = vpop.f32.mrb[2].mxu1 }
 0x209   :  { %v399_v33 = vpop.f32.mrb[3].mxu1  ;;  %v286_v34 = vsel %vm284_vm3, %v278_v32, -inf }
 0x20c   :  { %289 = vmax.xlane.f32.xlu0 %v286_v34 }
 0x295   :  { %v288_v35 = vpop.xlane.xlu0 %287 }
 0x296   :  { %v291_v36 = vsub.f32 %v285_v31, %v288_v35 }
 0x298   :  { %v293_v37 = vmul.f32 1.442695, %v291_v36 }
 0x299   :  { %v290_v38 = vpop.xlane.xlu0 %289 }
 0x29a   :  { %427 = vpow2.f32 %v293_v37  ;;  %v292_v39 = vsub.f32 %v286_v34, %v290_v38 }
 0x29c   :  { %v295_v40 = vmul.f32 1.442695, %v292_v39 }
 0x29e   :  { %429 = vpow2.f32 %v295_v40 }
 0x2a4   :  { %v428_v41 = vpop.eup %427 }
 0x2a5   :  { %297 = vadd.xlane.f32.xlu1 %v428_v41 }
 0x2a8   :  { %v430_v42 = vpop.eup %429 }
 0x2a9   :  { %299 = vadd.xlane.f32.xlu1 %v430_v42 }
 0x332   :  { %v298_v43 = vpop.xlane.xlu1 %297 }
 0x333   :  { %431 = vrcp.f32 %v298_v43 }
 0x336   :  { %v300_v44 = vpop.xlane.xlu1 %299 }
 0x337   :  { %433 = vrcp.f32 %v300_v44 }
 0x33d   :  { %v432_v45 = vpop.eup %431 }
 0x33e   :  { %v303_v46 = vmul.f32 %v432_v45, %v428_v41 }
 0x340   :  { %305 = vst [vmem:[#allocation8] sm:$0xff] %v303_v46 }
 0x341   :  { %v434_v47 = vpop.eup %433 }
 0x342   :  { %v304_v48 = vmul.f32 %v434_v47, %v430_v42 }
 0x344   :  { %306 = vst [vmem:[#allocation8 + $0x8] sm:$0xff] %v304_v48 }
 0x345   :  { %512 = shalt.err (!%p509_p0)
}
 0x346   :  { %s513_s25 = scalar_lea.hbm %s626_s3, 256 }
 0x347   :  { %p514_p1 = scmp.ne.s32.totalorder %s626_s3, %s513_s25  ;;  %p517_p2 = scmp.lt.u32.totalorder %s513_s25, %s626_s3 }
 0x349   :  { %p519_p3 = pnand %p517_p2, %p514_p1 }
 0x34b   :  { %522 = shalt.err (!%p519_p3)
}
 0x34c   :  { %s537_s30 = smov 128   ;;  %s538_s4 = smov 8  }
 0x34d   :  { %318 = dma.vmem_to_hbm [thread:$0]  %s313_s21, 256, %s626_s3, [#allocation4], %s537_s30, %s537_s30, %s538_s4  }
 0x34e   :  { %527 = dma.done.wait [#allocation4], 256  }
 0x34f   :  { %528 = vsyncadd [#allocation4], 4294967040 }
 0x350   :  { %322 = vsyncpa [#allocation3], 1 }
 0x351   :  { %323 = vsyncpa [#allocation6], 1 }
 0x352   :  { %324 = vsyncpa [#allocation4], 1 }

</bundles_post_ra>
